<compile_context>
chip_gen: v5e
topology: v5e:2x2
jax: 0.10.0
libtpu: 0.0.40
codegen_flags: <defaults>
</compile_context>

<pallas_src>
import jax
import jax.numpy as jnp
from jax.experimental import pallas as pl
from jax.experimental.pallas import tpu as pltpu


def _round_up(x, m):
    return (x + m - 1) // m * m


# ----------------------------------------------------------------------------
# Pallas kernel: fused double matmul with three lane-dense outputs (q, k, v)
# ----------------------------------------------------------------------------
def _lora_qkv_kernel(x_ref, a_ref, b_ref, q_ref, k_ref, v_ref):
    # x_ref: (TM, H)  f32     a_ref: (H, 3R) bf16    b_ref: (3R, 3H) f32
    # q_ref / k_ref / v_ref: (TM, H) out_dtype
    H = q_ref.shape[-1]
    # Cast x to bf16 in-kernel (saves a separate HBM pass in the wrapper).
    xa = jnp.dot(x_ref[...].astype(a_ref.dtype), a_ref[...],
                 preferred_element_type=jnp.float32)            # (TM, 3R) f32
    # Keep xa in f32 for the second GEMM (K = 3R = 24, negligible cost).
    y = jnp.dot(xa, b_ref[...],
                preferred_element_type=jnp.float32)             # (TM, 3H) f32
    q_ref[...] = y[:, 0 * H:1 * H].astype(q_ref.dtype)
    k_ref[...] = y[:, 1 * H:2 * H].astype(k_ref.dtype)
    v_ref[...] = y[:, 2 * H:3 * H].astype(v_ref.dtype)


def lora_qkv_fused(x2d, A_cat, B_block, *, tm=1024, out_dtype=jnp.bfloat16):
    """Fused LoRA q/k/v projection.

    x2d:     (M, H)    flattened activations (f32; cast to bf16 in-kernel)
    A_cat:   (H, 3R)   [A_q | A_k | A_v]                (bf16)
    B_block: (3R, 3H)  block-diagonal with B_q/B_k/B_v  (f32)
    returns  q, k, v   each (M, H) in `out_dtype`
    """
    M, H = x2d.shape
    R3 = A_cat.shape[1]
    H3 = B_block.shape[1]
    assert H3 == 3 * H

    # M tile: multiple of 8 (sublane), no host-side padding — the last grid
    # step may be ragged; Pallas masks the out-of-bounds writeback.
    tm = min(tm, _round_up(max(M, 1), 8))
    grid = (pl.cdiv(M, tm),)

    out_sds = jax.ShapeDtypeStruct((M, H), out_dtype)

    out_bytes = jnp.dtype(out_dtype).itemsize
    cost = pl.CostEstimate(
        flops=2 * M * H * R3 + 2 * M * R3 * H3,
        transcendentals=0,
        bytes_accessed=(M * H * x2d.dtype.itemsize            # x read
                        + 3 * M * H * out_bytes               # q,k,v writes
                        + A_cat.size * A_cat.dtype.itemsize
                        + B_block.size * B_block.dtype.itemsize),
    )

    q, k, v = pl.pallas_call(
        _lora_qkv_kernel,
        out_shape=(out_sds, out_sds, out_sds),
        grid=grid,
        in_specs=[
            # x streams through VMEM, one (tm, H) tile per grid step.
            pl.BlockSpec((tm, H), lambda m: (m, 0)),
            # LoRA weights: constant index_map -> DMA'd once, resident.
            pl.BlockSpec((H, R3), lambda m: (0, 0)),
            pl.BlockSpec((R3, H3), lambda m: (0, 0)),
        ],
        # Three lane-dense outputs; no post-kernel column slicing needed.
        out_specs=(
            pl.BlockSpec((tm, H), lambda m: (m, 0)),
            pl.BlockSpec((tm, H), lambda m: (m, 0)),
            pl.BlockSpec((tm, H), lambda m: (m, 0)),
        ),
        compiler_params=pltpu.CompilerParams(
            # M axis is the parallel axis (even megacore split on v7x).
            dimension_semantics=("parallel",),
            # tm=1024 + bf16 outputs -> ~15 MiB double-buffered working set;
            # 40 MiB gives headroom on v5e's 16 MiB / v6e-v7x's 32 MiB scoped
            # defaults while staying under v7x's 64 MiB physical VMEM.
            vmem_limit_bytes=40 * 1024 * 1024,
        ),
        cost_estimate=cost,
    )(x2d, A_cat, B_block)
    return q, k, v


# ----------------------------------------------------------------------------
# Model wrapper (glue in plain JAX)
# ----------------------------------------------------------------------------
class LoRAAdaptedModelPallas:
    def __init__(self, vocab_size=64, hidden_size=32, rank=8, seed=0):
        self.hidden_size = hidden_size
        self.rank = rank
        key = jax.random.PRNGKey(seed)
        k_emb, kqa, kqb, kka, kkb, kva, kvb = jax.random.split(key, 7)
        # toy token embedding table (stands in for model.embeddings)
        self.embedding = jax.random.normal(
            k_emb, (vocab_size, hidden_size), dtype=jnp.float32)
        # LoRA parameters, matching nn.Parameter(torch.randn(...)) shapes.
        A_q = jax.random.normal(kqa, (hidden_size, rank), dtype=jnp.float32)
        B_q = jax.random.normal(kqb, (rank, hidden_size), dtype=jnp.float32)
        A_k = jax.random.normal(kka, (hidden_size, rank), dtype=jnp.float32)
        B_k = jax.random.normal(kkb, (rank, hidden_size), dtype=jnp.float32)
        A_v = jax.random.normal(kva, (hidden_size, rank), dtype=jnp.float32)
        B_v = jax.random.normal(kvb, (rank, hidden_size), dtype=jnp.float32)
        # f32 copies for the reference path.
        self.A_qkv = jnp.stack([A_q, A_k, A_v], axis=0)   # (3, H, R)
        self.B_qkv = jnp.stack([B_q, B_k, B_v], axis=0)   # (3, R, H)

        # Fused operands for the kernel: A concatenated (bf16 for the MXU),
        # B block-diagonal kept in f32 (tiny, resident; keeps xa f32 path).
        self.A_cat = jnp.concatenate(
            [A_q, A_k, A_v], axis=1).astype(jnp.bfloat16)          # (H, 3R)
        B_block = jnp.zeros((3 * rank, 3 * hidden_size), jnp.float32)
        for i, Bi in enumerate((B_q, B_k, B_v)):
            B_block = B_block.at[
                i * rank:(i + 1) * rank,
                i * hidden_size:(i + 1) * hidden_size].set(Bi)
        self.B_block = B_block                                      # (3R, 3H)

    def __call__(self, input_ids, out_dtype=jnp.bfloat16):
        # input_ids: (batch, seq) int32
        bsz, seq = input_ids.shape
        H = self.hidden_size
        x = self.embedding[input_ids]                  # (B, S, H) glue, f32
        x2d = x.reshape(bsz * seq, H)                  # (M, H)
        q, k, v = lora_qkv_fused(
            x2d, self.A_cat, self.B_block, out_dtype=out_dtype)
        return (q.reshape(bsz, seq, H),
                k.reshape(bsz, seq, H),
                v.reshape(bsz, seq, H))


# ----------------------------------------------------------------------------
# Reference (plain JAX) for validation — same precision policy as the kernel
# (bf16 x / A operands, f32 accumulation, f32 xa for the second GEMM), but
# computed per-projection (unfused) and left in f32.
# ----------------------------------------------------------------------------
def _reference(model, input_ids):
    x = model.embedding[input_ids]
    xc = x.astype(jnp.bfloat16)
    out = []
    for i in range(3):
        xa = jnp.matmul(xc, model.A_qkv[i].astype(jnp.bfloat16),
                        preferred_element_type=jnp.float32)
        y = jnp.matmul(xa, model.B_qkv[i],
                       preferred_element_type=jnp.float32)
        out.append(y)
    return tuple(out)


if __name__ == "__main__":
    batch, seq, hidden, rank, vocab = 2, 8, 32, 8, 64

    model = LoRAAdaptedModelPallas(
        vocab_size=vocab, hidden_size=hidden, rank=rank, seed=0)

    key = jax.random.PRNGKey(0)
    input_ids = jax.random.randint(key, (batch, seq), 0, vocab, dtype=jnp.int32)

    q, k, v = model(input_ids)
    jax.block_until_ready((q, k, v))

    q_ref, k_ref, v_ref = _reference(model, input_ids)
    # bf16 operands + bf16 output rounding -> loosened tolerance vs the f32
    # PyTorch reference math (values here are O(10)).
    atol, rtol = 5e-1, 5e-2
    assert q.shape == (batch, seq, hidden)
    assert k.shape == (batch, seq, hidden)
    assert v.shape == (batch, seq, hidden)
    assert jnp.allclose(q.astype(jnp.float32), q_ref, atol=atol, rtol=rtol)
    assert jnp.allclose(k.astype(jnp.float32), k_ref, atol=atol, rtol=rtol)
    assert jnp.allclose(v.astype(jnp.float32), v_ref, atol=atol, rtol=rtol)

    print("KERNEL_OK")
</pallas_src>

<mosaic_0001>
module attributes {stable_mosaic.version = 11 : i64} {
  func.func @_lora_qkv_kernel(%arg0: i32, %arg1: memref<16x32xf32, #tpu.memory_space<vmem>>, %arg2: memref<32x24xbf16, #tpu.memory_space<vmem>>, %arg3: memref<24x96xf32, #tpu.memory_space<vmem>>, %arg4: memref<16x32xbf16, #tpu.memory_space<vmem>>, %arg5: memref<16x32xbf16, #tpu.memory_space<vmem>>, %arg6: memref<16x32xbf16, #tpu.memory_space<vmem>>) attributes {dimension_semantics = [#tpu.dimension_semantics<parallel>], iteration_bounds = array<i64: 1>, scalar_prefetch = 0 : i64, scratch_operands = 0 : i64, tpu.core_type = #tpu.core_type<tc>, window_params = [{transform_indices = @transform_0, window_bounds = array<i64: 16, 32>}, {pipeline_mode = #tpu.pipeline_mode<synchronous>, transform_indices = @transform_1, window_bounds = array<i64: 32, 24>}, {pipeline_mode = #tpu.pipeline_mode<synchronous>, transform_indices = @transform_2, window_bounds = array<i64: 24, 96>}, {transform_indices = @transform_3, window_bounds = array<i64: 16, 32>}, {transform_indices = @transform_4, window_bounds = array<i64: 16, 32>}, {transform_indices = @transform_5, window_bounds = array<i64: 16, 32>}]} {
    %c0 = arith.constant 0 : index
    %c0_0 = arith.constant 0 : index
    %0 = vector.load %arg1[%c0, %c0_0] : memref<16x32xf32, #tpu.memory_space<vmem>>, vector<16x32xf32>
    %1 = arith.truncf %0 : vector<16x32xf32> to vector<16x32xbf16>
    %c0_1 = arith.constant 0 : index
    %c0_2 = arith.constant 0 : index
    %2 = vector.load %arg2[%c0_1, %c0_2] : memref<32x24xbf16, #tpu.memory_space<vmem>>, vector<32x24xbf16>
    %cst = arith.constant dense<0.000000e+00> : vector<16x24xf32>
    %3 = tpu.matmul %1, %2, %cst {dimension_numbers = #tpu.dot_dimension_numbers<[1], [0], [0], [1], [0, 0, 1, 1], [], []>} : vector<16x32xbf16>, vector<32x24xbf16>, vector<16x24xf32> -> vector<16x24xf32>
    %c0_3 = arith.constant 0 : index
    %c0_4 = arith.constant 0 : index
    %4 = vector.load %arg3[%c0_3, %c0_4] : memref<24x96xf32, #tpu.memory_space<vmem>>, vector<24x96xf32>
    %cst_5 = arith.constant dense<0.000000e+00> : vector<16x96xf32>
    %5 = tpu.matmul %3, %4, %cst_5 {dimension_numbers = #tpu.dot_dimension_numbers<[1], [0], [0], [1], [0, 0, 1, 1], [], []>} : vector<16x24xf32>, vector<24x96xf32>, vector<16x96xf32> -> vector<16x96xf32>
    %6 = vector.extract_strided_slice %5 {offsets = [0, 0], sizes = [16, 32], strides = [1, 1]} : vector<16x96xf32> to vector<16x32xf32>
    %7 = arith.truncf %6 : vector<16x32xf32> to vector<16x32xbf16>
    %c0_6 = arith.constant 0 : index
    %c0_7 = arith.constant 0 : index
    %8 = vector.load %arg4[%c0_6, %c0_7] : memref<16x32xbf16, #tpu.memory_space<vmem>>, vector<16x32xbf16>
    tpu.vector_store %arg4[%c0_6, %c0_7], %7 {strides = array<i32>} : memref<16x32xbf16, #tpu.memory_space<vmem>>, vector<16x32xbf16>,
    %9 = vector.extract_strided_slice %5 {offsets = [0, 32], sizes = [16, 32], strides = [1, 1]} : vector<16x96xf32> to vector<16x32xf32>
    %10 = arith.truncf %9 : vector<16x32xf32> to vector<16x32xbf16>
    %c0_8 = arith.constant 0 : index
    %c0_9 = arith.constant 0 : index
    %11 = vector.load %arg5[%c0_8, %c0_9] : memref<16x32xbf16, #tpu.memory_space<vmem>>, vector<16x32xbf16>
    tpu.vector_store %arg5[%c0_8, %c0_9], %10 {strides = array<i32>} : memref<16x32xbf16, #tpu.memory_space<vmem>>, vector<16x32xbf16>,
    %12 = vector.extract_strided_slice %5 {offsets = [0, 64], sizes = [16, 32], strides = [1, 1]} : vector<16x96xf32> to vector<16x32xf32>
    %13 = arith.truncf %12 : vector<16x32xf32> to vector<16x32xbf16>
    %c0_10 = arith.constant 0 : index
    %c0_11 = arith.constant 0 : index
    %14 = vector.load %arg6[%c0_10, %c0_11] : memref<16x32xbf16, #tpu.memory_space<vmem>>, vector<16x32xbf16>
    tpu.vector_store %arg6[%c0_10, %c0_11], %13 {strides = array<i32>} : memref<16x32xbf16, #tpu.memory_space<vmem>>, vector<16x32xbf16>,
    return
  }
  func.func @transform_0(%arg0: i32) -> (i32, i32) {
    %c0_i32 = arith.constant 0 : i32
    %c0_i32_0 = arith.constant 0 : i32
    return %arg0, %c0_i32 : i32, i32
  }
  func.func @transform_1(%arg0: i32) -> (i32, i32) {
    %c0_i32 = arith.constant 0 : i32
    %c0_i32_0 = arith.constant 0 : i32
    %c0_i32_1 = arith.constant 0 : i32
    return %c0_i32, %c0_i32_0 : i32, i32
  }
  func.func @transform_2(%arg0: i32) -> (i32, i32) {
    %c0_i32 = arith.constant 0 : i32
    %c0_i32_0 = arith.constant 0 : i32
    %c0_i32_1 = arith.constant 0 : i32
    return %c0_i32, %c0_i32_0 : i32, i32
  }
  func.func @transform_3(%arg0: i32) -> (i32, i32) {
    %c0_i32 = arith.constant 0 : i32
    %c0_i32_0 = arith.constant 0 : i32
    return %arg0, %c0_i32 : i32, i32
  }
  func.func @transform_4(%arg0: i32) -> (i32, i32) {
    %c0_i32 = arith.constant 0 : i32
    %c0_i32_0 = arith.constant 0 : i32
    return %arg0, %c0_i32 : i32, i32
  }
  func.func @transform_5(%arg0: i32) -> (i32, i32) {
    %c0_i32 = arith.constant 0 : i32
    %c0_i32_0 = arith.constant 0 : i32
    return %arg0, %c0_i32 : i32, i32
  }
}

</mosaic_0001>

<bundles_post_ra>
// kernel: tpu_custom_call.1
= control target key start
LH: loop header
LB: loop body
LE: loop exit
PB: predicated region body
PF: predicated region fallthrough
CT: control target
= control target key end

     0   :  { %11 = vsyncpa [#allocation3], 0  ;;  %s387_s0 = inlined_call_operand.hbm [shape: f32[16,32], index: 0, kind: input, shape index: {}]   ;;  %s388_s1 = inlined_call_operand.vmem [shape: bf16[32,24], index: 1, kind: input, shape index: {}]   ;;  %s389_s2 = inlined_call_operand.vmem [shape: f32[24,96], index: 2, kind: input, shape index: {}]   ;;  %s390_s3 = inlined_call_operand.hbm [shape: bf16[16,32], index: 3, kind: output, shape index: {0}]   ;;  %s391_s4 = inlined_call_operand.hbm [shape: bf16[16,32], index: 4, kind: output, shape index: {1}]   ;;  %s392_s5 = inlined_call_operand.hbm [shape: bf16[16,32], index: 5, kind: output, shape index: {2}]  }
   0x1   :  { %12 = vsyncpa [#allocation4], 0 }
   0x2   :  { %13 = vsyncpa [#allocation7], 0  ;;  %s18_s20 = sshll.u32 %s387_s0, 4  ;;  %s307_s21 = smov [#allocation2]   ;;  %s19_s20 = int_to_ptr.hbm [resolvable:$true] %s18_s20 }
   0x3   :  { %s20_s22 = sshll.u32 %s307_s21, 4  ;;  %s308_s23 = smov 128   ;;  %s21_s22 = int_to_ptr.vmem [resolvable:$true] %s20_s22 }
   0x4   :  { %s309_s24 = smov 8  }
   0x5   :  { %26 = dma.hbm_to_vmem [thread:$0]  %s19_s20, 256, %s21_s22, [#allocation3], %s308_s23, %s308_s23, %s309_s24  }
   0x6   :  { %301 = dma.done.wait [#allocation3], 256  }
   0x7   :  { %302 = vsyncadd [#allocation3], 4294967040  ;;  %v195_v0 = vld [vmem:[%s388_s1 + $0x8] sm:$0xff]  ;;  %v75_v1 = vld [vmem:[%s389_s2 + $0x10] sm:$0xff]  ;;  %vm55_vm0 = vcmask 261120   ;;  %vm76_vm1 = vcmask 195584  }
   0x8   :  { %v74_v2 = vld [vmem:[%s389_s2 + $0x8] sm:$0xff]  ;;  %65 = vmatpush.bf16.msra.mxu0 %v195_v0  ;;  %v194_v3 = vld [vmem:[%s388_s1] sm:$0xff]  ;;  %96 = vmatpush.msra.mxu1 %v75_v1  ;;  %vm108_vm2 = vcmask 257024   ;;  %s310_s1 = smov 64   ;;  %s311_s9 = smov 96  }
   0x9   :  { %v36_v4 = vld [vmem:[#allocation2] sm:$0xff]  ;;  %v37_v5 = vld [vmem:[#allocation2 + $0x8] sm:$0xff]  ;;  %s312_s10 = smov [#allocation5]   ;;  %s135_s13 = sshll.u32 %s390_s3, 4  ;;  %s136_s13 = int_to_ptr.hbm [resolvable:$true] %s135_s13 }
   0xa   :  { %97 = vmatpush.msra.mxu1 %v74_v2  ;;  %v38_v6 = vpack.c.bf16 %v37_v5, %v36_v4  ;;  %v73_v7 = vld [vmem:[%s389_s2] sm:$0xff]  ;;  %s133_s11 = sshll.u32 %s312_s10, 4  ;;  %s313_s14 = smov 4   ;;  %s134_s11 = int_to_ptr.vmem [resolvable:$true] %s133_s11 }
   0xb   :  { %s314_s3 = smov [#allocation6]   ;;  %s148_s18 = sshll.u32 %s391_s4, 4  ;;  %s149_s18 = int_to_ptr.hbm [resolvable:$true] %s148_s18 }
   0xc   :  { %66 = vmatpush.bf16.msra.mxu0 %v194_v3  ;;  %98 = vmatpush.msra.mxu1 %v73_v7  ;;  %s146_s15 = sshll.u32 %s314_s3, 4  ;;  %s315_s19 = smov [#allocation8]   ;;  %s147_s15 = int_to_ptr.vmem [resolvable:$true] %s146_s15 }
   0xd   :  { %s159_s20 = sshll.u32 %s315_s19, 4  ;;  %s161_s23 = sshll.u32 %s392_s5, 4  ;;  %s160_s20 = int_to_ptr.vmem [resolvable:$true] %s159_s20  ;;  %s162_s23 = int_to_ptr.hbm [resolvable:$true] %s161_s23 }
   0xf   :  { %191 = vmatmul.msk.bf16.vlgmr.msra.gmra.mxu0 %vm55_vm0, %v38_v6 }
  0x8c   :  { %v68_v8 = vpop.f32.mrf.mxu0 }
  0x8d   :  { %192 = vmatmul.msk.f32.vlgmr.msra.gmra.mxu1 %vm76_vm1, %v68_v8 }
  0x94   :  { %v70_v9 = vpop.f32.mrf.mxu0 }
  0x95   :  { %193 = vmatmul.msk.f32.gmra.mxu1 %vm76_vm1, %v70_v9 }
 0x10a   :  { %v100_v10 = vpop.f32.mrf.mxu1 }
 0x10b   :  { %v106_v11 = vpack.c.bf16 %v100_v10, %v100_v10 }
 0x10d   :  { %109 = vst.msk [vmem:[#allocation5] sm:$0xf] %vm108_vm2, %v106_v11  ;;  %121 = vrot.lane.b32.xlu1 %v106_v11, %s310_s1  ;;  %113 = vrot.lane.b32.xlu0 %v106_v11, %s311_s9 }
 0x112   :  { %v103_v12 = vpop.f32.mrf.mxu1 }
 0x113   :  { %v107_v13 = vpack.c.bf16 %v103_v12, %v103_v12 }
 0x115   :  { %110 = vst.msk [vmem:[#allocation5 + $0x4] sm:$0xf] %vm108_vm2, %v107_v13  ;;  %123 = vrot.lane.b32.xlu1 %v107_v13, %s310_s1  ;;  %115 = vrot.lane.b32.xlu0 %v107_v13, %s311_s9 }
 0x116   :  { %141 = dma.vmem_to_hbm [thread:$0]  %s134_s11, 128, %s136_s13, [#allocation4], %s310_s1, %s310_s1, %s313_s14  }
 0x17f   :  { %v122_v14 = vpop.permute.xlu1 %121  ;;  %v114_v15 = vpop.permute.xlu0 %113 }
 0x180   :  { %127 = vst.msk [vmem:[#allocation8] sm:$0xf] %vm108_vm2, %v122_v14 }
 0x181   :  { %119 = vst.msk [vmem:[#allocation6] sm:$0xf] %vm108_vm2, %v114_v15 }
 0x187   :  { %v124_v16 = vpop.permute.xlu1 %123  ;;  %v116_v17 = vpop.permute.xlu0 %115 }
 0x188   :  { %128 = vst.msk [vmem:[#allocation8 + $0x4] sm:$0xf] %vm108_vm2, %v124_v16 }
 0x189   :  { %120 = vst.msk [vmem:[#allocation6 + $0x4] sm:$0xf] %vm108_vm2, %v116_v17 }
 0x18a   :  { %154 = dma.vmem_to_hbm [thread:$0]  %s147_s15, 128, %s149_s18, [#allocation7], %s310_s1, %s310_s1, %s313_s14  }
 0x18b   :  { %167 = dma.vmem_to_hbm [thread:$0]  %s160_s20, 128, %s162_s23, [#allocation7], %s310_s1, %s310_s1, %s313_s14  }
 0x18c   :  { %303 = dma.done.wait [#allocation4], 128  }
 0x18d   :  { %304 = vsyncadd [#allocation4], 4294967168 }
 0x18e   :  { %305 = dma.done.wait [#allocation7], 256  }
 0x18f   :  { %306 = vsyncadd [#allocation7], 4294967040 }
 0x190   :  { %180 = vsyncpa [#allocation3], 1 }
 0x191   :  { %181 = vsyncpa [#allocation4], 1 }
 0x192   :  { %182 = vsyncpa [#allocation7], 1 }

</bundles_post_ra>
